<compile_context>
chip_gen: v5e
topology: v5e:2x2
jax: 0.10.0
libtpu: 0.0.40
codegen_flags: <defaults>
</compile_context>

<pallas_src>
import functools

import jax
import jax.numpy as jnp
from jax.experimental import pallas as pl
from jax.experimental.pallas import tpu as pltpu

K_T = 5       # temporal kernel size of the Fuse conv
PAD_T = 2     # temporal zero padding
BN_EPS = 1e-5


# ---------------------------------------------------------------------------
# Pallas kernel: fused temporal conv (4 stacked fuse stages) + folded-BN bias
# + ReLU + channel-concat with the slow pathway, all in one pass.
# ---------------------------------------------------------------------------
def _fuse_concat_kernel(alpha, cin, t_out, c_slow,
                        slow_ref, fast_ref, w_ref, b_ref, out_ref):
    # slow_ref: (1, T_out, C_slow, HWt)       f32  -- slow pathway tile
    # fast_ref: (1, T_pad*Cin, HWt)           bf16 -- whole padded clip, (T,C) flat
    # w_ref:    (Cout_total, K_T*Cin)         bf16 -- BN-folded, 4 stages stacked
    # b_ref:    (Cout_total, 1)               f32  -- folded BN bias
    # out_ref:  (1, T_out, C_slow+Cout, HWt)  f32  -- concatenated output
    cout = w_ref.shape[0]
    hw = out_ref.shape[-1]
    kcin = K_T * cin

    # Slow pathway pass-through into channels [0, c_slow): one bulk store.
    out_ref[0, :, :c_slow, :] = slow_ref[0].astype(out_ref.dtype)

    # Hoisted loads / broadcast (reused across all T_out frames).
    w = w_ref[...]
    b = jnp.broadcast_to(b_ref[...], (cout, hw))

    for t in range(t_out):               # short static unroll over output frames
        start = t * alpha * cin          # static Python int -> aligned slice
        x = fast_ref[0, pl.ds(start, kcin), :]                    # (K*Cin, HWt) bf16
        acc = jnp.dot(w, x, preferred_element_type=jnp.float32)   # (Cout, HWt) f32
        y = jnp.maximum(acc + b, 0.0)                             # bias + ReLU, f32
        out_ref[0, t, pl.ds(c_slow, cout), :] = y.astype(out_ref.dtype)


def fuse_and_concat(slow, fast, w_all, b_all, alpha):
    """slow: (N, T_out, C_slow, HW), fast: (N, T, Cin, HW)
    -> (N, T_out, C_slow + Cout_total, HW) in slow.dtype (f32)."""
    N, T_slow, C_slow, HW = slow.shape
    Nf, T, Cin, HWf = fast.shape
    assert N == Nf and HW == HWf
    Cout = w_all.shape[0]

    # bf16 at the boundary (halves HBM/VMEM traffic; MXU-native), pad T once.
    fast_b = fast.astype(jnp.bfloat16)
    fast_pad = jnp.pad(fast_b, ((0, 0), (PAD_T, PAD_T), (0, 0), (0, 0)))
    T_pad = T + 2 * PAD_T
    T_out = (T_pad - K_T) // alpha + 1
    assert T_out == T_slow, "fuse output frames must match slow pathway frames"

    # Sublane alignment for the in-kernel channel concat (SlowFast channel
    # counts are always multiples of 8 in practice).
    assert C_slow % 8 == 0 and Cout % 8 == 0, \
        "fused concat path needs channel counts that are multiples of 8"

    # Pre-flatten (T_pad, Cin) -> rows, so each output frame's 5-tap window is a
    # contiguous (K_T*Cin, HW) slab -> one MXU matmul, no in-kernel reshape.
    fast_flat = fast_pad.reshape(N, T_pad * Cin, HW)

    # Lane tiling on HW (keeps VMEM bounded at real SlowFast sizes, esp. v7x).
    if HW % 512 == 0:
        hw_tile = 512
    elif HW % 256 == 0:
        hw_tile = 256
    elif HW % 128 == 0:
        hw_tile = 128
    else:
        hw_tile = HW
    n_hw = HW // hw_tile

    C_total = C_slow + Cout
    kernel = functools.partial(_fuse_concat_kernel, alpha, Cin, T_out, C_slow)

    out = pl.pallas_call(
        kernel,
        out_shape=jax.ShapeDtypeStruct((N, T_out, C_total, HW), slow.dtype),
        grid=(N, n_hw),
        in_specs=[
            pl.BlockSpec((1, T_out, C_slow, hw_tile), lambda n, h: (n, 0, 0, h)),
            pl.BlockSpec((1, T_pad * Cin, hw_tile), lambda n, h: (n, 0, h)),
            pl.BlockSpec((Cout, K_T * Cin), lambda n, h: (0, 0)),
            pl.BlockSpec((Cout, 1), lambda n, h: (0, 0)),
        ],
        out_specs=pl.BlockSpec((1, T_out, C_total, hw_tile),
                               lambda n, h: (n, 0, 0, h)),
        compiler_params=pltpu.CompilerParams(
            dimension_semantics=("parallel", "parallel")),
    )(slow, fast_flat, w_all, b_all)
    return out


# ---------------------------------------------------------------------------
# Parameter prep: fold BatchNorm (inference) into conv weights, stack 4 stages
# ---------------------------------------------------------------------------
def fold_and_stack(stage_params):
    ws, bs = [], []
    for p in stage_params:
        scale = p['gamma'] * jax.lax.rsqrt(p['var'] + BN_EPS)        # (Cout_s,)
        bias = p['beta'] - p['mean'] * scale                          # (Cout_s,)
        # torch Conv3d weight (Cout, Cin, kT, 1, 1) -> (kT, Cin, Cout), folded.
        w = jnp.transpose(p['w_torch'], (2, 1, 0)) * scale            # (K, Cin, Cout)
        k, cin, cout = w.shape
        ws.append(w.reshape(k * cin, cout).T)                         # (Cout_s, K*Cin)
        bs.append(bias)
    w_all = jnp.concatenate(ws, axis=0).astype(jnp.bfloat16)          # (Cout_tot, K*Cin)
    b_all = jnp.concatenate(bs, axis=0)[:, None].astype(jnp.float32)  # (Cout_tot, 1)
    return w_all, b_all


def init_fuse_params(key, cin):
    cout = 2 * cin
    kw, kg, kb, km, kv = jax.random.split(key, 5)
    w_torch = jax.random.normal(kw, (cout, cin, K_T), jnp.float32) * 0.05
    gamma = 1.0 + 0.1 * jax.random.normal(kg, (cout,), jnp.float32)
    beta = 0.1 * jax.random.normal(kb, (cout,), jnp.float32)
    mean = 0.1 * jax.random.normal(km, (cout,), jnp.float32)
    var = jnp.abs(1.0 + 0.1 * jax.random.normal(kv, (cout,), jnp.float32))
    return dict(w_torch=w_torch, gamma=gamma, beta=beta, mean=mean, var=var)


# ---------------------------------------------------------------------------
# Pure-JAX references (correctness checks only)
# ---------------------------------------------------------------------------
def fuse_reference_stacked(w_all, b_all, fast, alpha):
    """Same bf16-rounded data path as the kernel, f32 math (tight check)."""
    N, T, Cin, HW = fast.shape
    xb = fast.astype(jnp.bfloat16).astype(jnp.float32)
    xp = jnp.pad(xb, ((0, 0), (PAD_T, PAD_T), (0, 0), (0, 0)))
    T_pad = T + 2 * PAD_T
    t_out = (T_pad - K_T) // alpha + 1
    W = w_all.astype(jnp.float32)
    outs = []
    for t in range(t_out):
        win = xp[:, t * alpha:t * alpha + K_T].reshape(N, K_T * Cin, HW)
        outs.append(jnp.einsum('oc,nch->noh', W, win,
                               precision=jax.lax.Precision.HIGHEST))
    y = jnp.stack(outs, axis=1) + b_all.reshape(1, 1, -1, 1)
    return jnp.maximum(y, 0.0)


def fuse_reference_module(p, fast, alpha):
    """Full-precision per-stage Conv3d + BN(inference) + ReLU (module semantics)."""
    fast_pad = jnp.pad(fast, ((0, 0), (PAD_T, PAD_T), (0, 0), (0, 0)))
    T_pad = fast_pad.shape[1]
    t_out = (T_pad - K_T) // alpha + 1
    w = jnp.transpose(p['w_torch'], (2, 1, 0))                   # (K, Cin, Cout)
    outs = []
    for t in range(t_out):
        win = fast_pad[:, t * alpha:t * alpha + K_T]             # (N, K, Cin, HW)
        outs.append(jnp.einsum('nkch,kco->noh', win, w,
                               precision=jax.lax.Precision.HIGHEST))
    y = jnp.stack(outs, axis=1)                                  # (N, T_out, Cout, HW)
    scale = (p['gamma'] * jax.lax.rsqrt(p['var'] + BN_EPS))[None, None, :, None]
    y = (y - p['mean'][None, None, :, None]) * scale + p['beta'][None, None, :, None]
    return jnp.maximum(y, 0.0)


# ---------------------------------------------------------------------------
# Module-level glue
# ---------------------------------------------------------------------------
def slowfast_forward(params, slow, fast, alpha):
    # TODO(synk): stage1..stage5 (Stage1 / StageBuild / ResNet) definitions are
    # unavailable -> identity; classification head unavailable -> omitted.
    # NOTE: batching the 4 fuse stages into one pallas_call is only valid while
    # the intermediate stages are identity (per-stage channel counts otherwise
    # differ); revisit when the ResNet stages are added.
    w_all, b_all = fold_and_stack([params[f'fuse{i}'] for i in range(1, 5)])
    # Sequential torch.cat([slow, f2s_i], dim=1) over 4 identity-separated
    # stages == one concat of [slow, f2s_1..4]; the kernel writes it directly.
    slow = fuse_and_concat(slow, fast, w_all, b_all, alpha)
    return slow, fast


if __name__ == "__main__":
    key = jax.random.PRNGKey(0)

    # Small shapes consistent with the module's forward:
    # slow pathway has T_fast // alpha frames; fuse keeps temporal dims matched.
    N, C_fast, C_slow = 2, 8, 16
    H, W = 8, 16
    HW = H * W                      # 128 -> lane-dense
    alpha = 4
    T_fast = 16
    T_slow = T_fast // alpha

    k1, k2, k3 = jax.random.split(key, 3)
    # torch NCDHW inputs
    slow_torch = jax.random.normal(k1, (N, C_slow, T_slow, H, W), jnp.float32)
    fast_torch = jax.random.normal(k2, (N, C_fast, T_fast, H, W), jnp.float32)

    # kernel layout (N, T, C, HW): HW on the lane axis
    slow = jnp.transpose(slow_torch, (0, 2, 1, 3, 4)).reshape(N, T_slow, C_slow, HW)
    fast = jnp.transpose(fast_torch, (0, 2, 1, 3, 4)).reshape(N, T_fast, C_fast, HW)

    pkeys = jax.random.split(k3, 4)
    params = {f'fuse{i + 1}': init_fuse_params(pkeys[i], C_fast) for i in range(4)}

    slow_out, fast_out = slowfast_forward(params, slow, fast, alpha)
    slow_out = jax.block_until_ready(slow_out)
    fast_out = jax.block_until_ready(fast_out)

    # --- correctness checks -------------------------------------------------
    C_out_total = 4 * 2 * C_fast
    assert slow_out.shape == (N, T_slow, C_slow + C_out_total, HW)
    assert fast_out.shape == (N, T_fast, C_fast, HW)

    # Slow pathway pass-through must be an exact copy.
    assert jnp.array_equal(slow_out[:, :, :C_slow, :], slow), \
        "slow passthrough mismatch in fused concat"

    f2s_ker = slow_out[:, :, C_slow:, :]

    # Tight check: same bf16-rounded data, f32 math in the reference.
    w_all, b_all = fold_and_stack([params[f'fuse{i}'] for i in range(1, 5)])
    f2s_ref = fuse_reference_stacked(w_all, b_all, fast, alpha)
    assert jnp.allclose(f2s_ker, f2s_ref, atol=1e-4, rtol=1e-3), \
        "fused kernel mismatch vs stacked reference"

    # Loose check vs full-precision module semantics (bf16 rounding tolerance).
    for i in range(4):
        ref_i = fuse_reference_module(params[f'fuse{i + 1}'], fast, alpha)
        ker_i = f2s_ker[:, :, i * 2 * C_fast:(i + 1) * 2 * C_fast, :]
        assert jnp.allclose(ker_i, ref_i, atol=5e-2, rtol=5e-2), \
            f"fuse{i + 1} mismatch vs f32 module reference"

    print("KERNEL_OK")
</pallas_src>

<mosaic_0001>
module attributes {stable_mosaic.version = 11 : i64} {
  func.func @_fuse_concat_kernel(%arg0: i32, %arg1: i32, %arg2: memref<1x4x16x128xf32, #tpu.memory_space<vmem>>, %arg3: memref<1x160x128xbf16, #tpu.memory_space<vmem>>, %arg4: memref<64x40xbf16, #tpu.memory_space<vmem>>, %arg5: memref<64x1xf32, #tpu.memory_space<vmem>>, %arg6: memref<1x4x80x128xf32, #tpu.memory_space<vmem>>) attributes {dimension_semantics = [#tpu.dimension_semantics<parallel>, #tpu.dimension_semantics<parallel>], iteration_bounds = array<i64: 2, 1>, scalar_prefetch = 0 : i64, scratch_operands = 0 : i64, tpu.core_type = #tpu.core_type<tc>, window_params = [{transform_indices = @transform_0, window_bounds = array<i64: 1, 4, 16, 128>}, {transform_indices = @transform_1, window_bounds = array<i64: 1, 160, 128>}, {pipeline_mode = #tpu.pipeline_mode<synchronous>, transform_indices = @transform_2, window_bounds = array<i64: 64, 40>}, {pipeline_mode = #tpu.pipeline_mode<synchronous>, transform_indices = @transform_3, window_bounds = array<i64: 64, 1>}, {transform_indices = @transform_4, window_bounds = array<i64: 1, 4, 80, 128>}]} {
    %c0 = arith.constant 0 : index
    %c0_0 = arith.constant 0 : index
    %c0_1 = arith.constant 0 : index
    %c0_2 = arith.constant 0 : index
    %0 = vector.load %arg2[%c0, %c0_0, %c0_1, %c0_2] : memref<1x4x16x128xf32, #tpu.memory_space<vmem>>, vector<1x4x16x128xf32>
    %1 = vector.shape_cast %0 : vector<1x4x16x128xf32> to vector<4x16x128xf32>
    %c0_3 = arith.constant 0 : index
    %c0_4 = arith.constant 0 : index
    %c0_5 = arith.constant 0 : index
    %c0_6 = arith.constant 0 : index
    %2 = vector.load %arg6[%c0_3, %c0_4, %c0_5, %c0_6] : memref<1x4x80x128xf32, #tpu.memory_space<vmem>>, vector<1x4x16x128xf32>
    %3 = vector.shape_cast %2 : vector<1x4x16x128xf32> to vector<4x16x128xf32>
    %4 = vector.shape_cast %1 : vector<4x16x128xf32> to vector<1x4x16x128xf32>
    tpu.vector_store %arg6[%c0_3, %c0_4, %c0_5, %c0_6], %4 {strides = array<i32>} : memref<1x4x80x128xf32, #tpu.memory_space<vmem>>, vector<1x4x16x128xf32>,
    %c0_7 = arith.constant 0 : index
    %c0_8 = arith.constant 0 : index
    %5 = vector.load %arg4[%c0_7, %c0_8] : memref<64x40xbf16, #tpu.memory_space<vmem>>, vector<64x40xbf16>
    %c0_9 = arith.constant 0 : index
    %c0_10 = arith.constant 0 : index
    %6 = vector.load %arg5[%c0_9, %c0_10] : memref<64x1xf32, #tpu.memory_space<vmem>>, vector<64x1xf32>
    %7 = vector.shape_cast %6 : vector<64x1xf32> to vector<64x1xf32>
    %8 = vector.broadcast %7 : vector<64x1xf32> to vector<64x128xf32>
    %c0_11 = arith.constant 0 : index
    %c0_12 = arith.constant 0 : index
    %c0_13 = arith.constant 0 : index
    %9 = vector.load %arg3[%c0_11, %c0_12, %c0_13] : memref<1x160x128xbf16, #tpu.memory_space<vmem>>, vector<1x40x128xbf16>
    %10 = vector.shape_cast %9 : vector<1x40x128xbf16> to vector<40x128xbf16>
    %cst = arith.constant dense<0.000000e+00> : vector<64x128xf32>
    %11 = tpu.matmul %5, %10, %cst {dimension_numbers = #tpu.dot_dimension_numbers<[1], [0], [0], [1], [0, 0, 1, 1], [], []>} : vector<64x40xbf16>, vector<40x128xbf16>, vector<64x128xf32> -> vector<64x128xf32>
    %12 = arith.addf %11, %8 : vector<64x128xf32>
    %cst_14 = arith.constant 0.000000e+00 : f32
    %13 = vector.broadcast %cst_14 : f32 to vector<64x128xf32>
    %14 = arith.maximumf %12, %13 : vector<64x128xf32>
    %c0_15 = arith.constant 0 : index
    %c0_16 = arith.constant 0 : index
    %c16 = arith.constant 16 : index
    %c0_17 = arith.constant 0 : index
    %15 = vector.load %arg6[%c0_15, %c0_16, %c16, %c0_17] : memref<1x4x80x128xf32, #tpu.memory_space<vmem>>, vector<1x1x64x128xf32>
    %16 = vector.shape_cast %15 : vector<1x1x64x128xf32> to vector<64x128xf32>
    %17 = vector.shape_cast %14 : vector<64x128xf32> to vector<1x1x64x128xf32>
    tpu.vector_store %arg6[%c0_15, %c0_16, %c16, %c0_17], %17 {strides = array<i32>} : memref<1x4x80x128xf32, #tpu.memory_space<vmem>>, vector<1x1x64x128xf32>,
    %c0_18 = arith.constant 0 : index
    %c32 = arith.constant 32 : index
    %c0_19 = arith.constant 0 : index
    %18 = vector.load %arg3[%c0_18, %c32, %c0_19] : memref<1x160x128xbf16, #tpu.memory_space<vmem>>, vector<1x40x128xbf16>
    %19 = vector.shape_cast %18 : vector<1x40x128xbf16> to vector<40x128xbf16>
    %cst_20 = arith.constant dense<0.000000e+00> : vector<64x128xf32>
    %20 = tpu.matmul %5, %19, %cst_20 {dimension_numbers = #tpu.dot_dimension_numbers<[1], [0], [0], [1], [0, 0, 1, 1], [], []>} : vector<64x40xbf16>, vector<40x128xbf16>, vector<64x128xf32> -> vector<64x128xf32>
    %21 = arith.addf %20, %8 : vector<64x128xf32>
    %cst_21 = arith.constant 0.000000e+00 : f32
    %22 = vector.broadcast %cst_21 : f32 to vector<64x128xf32>
    %23 = arith.maximumf %21, %22 : vector<64x128xf32>
    %c0_22 = arith.constant 0 : index
    %c1 = arith.constant 1 : index
    %c16_23 = arith.constant 16 : index
    %c0_24 = arith.constant 0 : index
    %24 = vector.load %arg6[%c0_22, %c1, %c16_23, %c0_24] : memref<1x4x80x128xf32, #tpu.memory_space<vmem>>, vector<1x1x64x128xf32>
    %25 = vector.shape_cast %24 : vector<1x1x64x128xf32> to vector<64x128xf32>
    %26 = vector.shape_cast %23 : vector<64x128xf32> to vector<1x1x64x128xf32>
    tpu.vector_store %arg6[%c0_22, %c1, %c16_23, %c0_24], %26 {strides = array<i32>} : memref<1x4x80x128xf32, #tpu.memory_space<vmem>>, vector<1x1x64x128xf32>,
    %c0_25 = arith.constant 0 : index
    %c64 = arith.constant 64 : index
    %c0_26 = arith.constant 0 : index
    %27 = vector.load %arg3[%c0_25, %c64, %c0_26] : memref<1x160x128xbf16, #tpu.memory_space<vmem>>, vector<1x40x128xbf16>
    %28 = vector.shape_cast %27 : vector<1x40x128xbf16> to vector<40x128xbf16>
    %cst_27 = arith.constant dense<0.000000e+00> : vector<64x128xf32>
    %29 = tpu.matmul %5, %28, %cst_27 {dimension_numbers = #tpu.dot_dimension_numbers<[1], [0], [0], [1], [0, 0, 1, 1], [], []>} : vector<64x40xbf16>, vector<40x128xbf16>, vector<64x128xf32> -> vector<64x128xf32>
    %30 = arith.addf %29, %8 : vector<64x128xf32>
    %cst_28 = arith.constant 0.000000e+00 : f32
    %31 = vector.broadcast %cst_28 : f32 to vector<64x128xf32>
    %32 = arith.maximumf %30, %31 : vector<64x128xf32>
    %c0_29 = arith.constant 0 : index
    %c2 = arith.constant 2 : index
    %c16_30 = arith.constant 16 : index
    %c0_31 = arith.constant 0 : index
    %33 = vector.load %arg6[%c0_29, %c2, %c16_30, %c0_31] : memref<1x4x80x128xf32, #tpu.memory_space<vmem>>, vector<1x1x64x128xf32>
    %34 = vector.shape_cast %33 : vector<1x1x64x128xf32> to vector<64x128xf32>
    %35 = vector.shape_cast %32 : vector<64x128xf32> to vector<1x1x64x128xf32>
    tpu.vector_store %arg6[%c0_29, %c2, %c16_30, %c0_31], %35 {strides = array<i32>} : memref<1x4x80x128xf32, #tpu.memory_space<vmem>>, vector<1x1x64x128xf32>,
    %c0_32 = arith.constant 0 : index
    %c96 = arith.constant 96 : index
    %c0_33 = arith.constant 0 : index
    %36 = vector.load %arg3[%c0_32, %c96, %c0_33] : memref<1x160x128xbf16, #tpu.memory_space<vmem>>, vector<1x40x128xbf16>
    %37 = vector.shape_cast %36 : vector<1x40x128xbf16> to vector<40x128xbf16>
    %cst_34 = arith.constant dense<0.000000e+00> : vector<64x128xf32>
    %38 = tpu.matmul %5, %37, %cst_34 {dimension_numbers = #tpu.dot_dimension_numbers<[1], [0], [0], [1], [0, 0, 1, 1], [], []>} : vector<64x40xbf16>, vector<40x128xbf16>, vector<64x128xf32> -> vector<64x128xf32>
    %39 = arith.addf %38, %8 : vector<64x128xf32>
    %cst_35 = arith.constant 0.000000e+00 : f32
    %40 = vector.broadcast %cst_35 : f32 to vector<64x128xf32>
    %41 = arith.maximumf %39, %40 : vector<64x128xf32>
    %c0_36 = arith.constant 0 : index
    %c3 = arith.constant 3 : index
    %c16_37 = arith.constant 16 : index
    %c0_38 = arith.constant 0 : index
    %42 = vector.load %arg6[%c0_36, %c3, %c16_37, %c0_38] : memref<1x4x80x128xf32, #tpu.memory_space<vmem>>, vector<1x1x64x128xf32>
    %43 = vector.shape_cast %42 : vector<1x1x64x128xf32> to vector<64x128xf32>
    %44 = vector.shape_cast %41 : vector<64x128xf32> to vector<1x1x64x128xf32>
    tpu.vector_store %arg6[%c0_36, %c3, %c16_37, %c0_38], %44 {strides = array<i32>} : memref<1x4x80x128xf32, #tpu.memory_space<vmem>>, vector<1x1x64x128xf32>,
    return
  }
  func.func @transform_0(%arg0: i32, %arg1: i32) -> (i32, i32, i32, i32) {
    %c0_i32 = arith.constant 0 : i32
    %c0_i32_0 = arith.constant 0 : i32
    %c0_i32_1 = arith.constant 0 : i32
    return %arg0, %c0_i32, %c0_i32_0, %arg1 : i32, i32, i32, i32
  }
  func.func @transform_1(%arg0: i32, %arg1: i32) -> (i32, i32, i32) {
    %c0_i32 = arith.constant 0 : i32
    %c0_i32_0 = arith.constant 0 : i32
    return %arg0, %c0_i32, %arg1 : i32, i32, i32
  }
  func.func @transform_2(%arg0: i32, %arg1: i32) -> (i32, i32) {
    %c0_i32 = arith.constant 0 : i32
    %c0_i32_0 = arith.constant 0 : i32
    %c0_i32_1 = arith.constant 0 : i32
    return %c0_i32, %c0_i32_0 : i32, i32
  }
  func.func @transform_3(%arg0: i32, %arg1: i32) -> (i32, i32) {
    %c0_i32 = arith.constant 0 : i32
    %c0_i32_0 = arith.constant 0 : i32
    %c0_i32_1 = arith.constant 0 : i32
    return %c0_i32, %c0_i32_0 : i32, i32
  }
  func.func @transform_4(%arg0: i32, %arg1: i32) -> (i32, i32, i32, i32) {
    %c0_i32 = arith.constant 0 : i32
    %c0_i32_0 = arith.constant 0 : i32
    %c0_i32_1 = arith.constant 0 : i32
    return %arg0, %c0_i32, %c0_i32_0, %arg1 : i32, i32, i32, i32
  }
}

</mosaic_0001>

<bundles_post_ra>
// kernel: tpu_custom_call.1
= control target key start
LH: loop header
LB: loop body
LE: loop exit
PB: predicated region body
PF: predicated region fallthrough
CT: control target
= control target key end

     0   :  { %s1429_s0 = inlined_call_operand.hbm [shape: f32[2,4,16,128], index: 0, kind: input, shape index: {}]   ;;  %s1430_s1 = inlined_call_operand.hbm [shape: bf16[2,160,128], index: 1, kind: input, shape index: {}]   ;;  %s1431_s2 = inlined_call_operand.vmem [shape: bf16[64,40], index: 2, kind: input, shape index: {}]   ;;  %s1432_s3 = inlined_call_operand.vmem [shape: f32[64,1], index: 3, kind: input, shape index: {}]   ;;  %s1433_s4 = inlined_call_operand.hbm [shape: f32[2,4,80,128], index: 4, kind: output, shape index: {}]  }
   0x1   :  { %1435 = sst [smem:[#allocation13_spill]] %s1429_s0 }
   0x2   :  { %9 = vsyncpa [#allocation3], 0 }
   0x3   :  { %11 = vsyncpa [#allocation3 + $0x1], 0 }
   0x4   :  { %12 = vsyncpa [#allocation6], 0 }
   0x5   :  { %14 = vsyncpa [#allocation6 + $0x1], 0 }
   0x6   :  { %15 = vsyncpa [#allocation4], 0 }
   0x7   :  { %17 = vsyncpa [#allocation4 + $0x1], 0  ;;  %s1165_s15 = smov 0   ;;  %s1167_s16 = smov 0  }
   0x8   :  { %s1169_s17 = smov 0   ;;  %s1171_s18 = smov 0  }
   0x9   :  { %s1173_s19 = smov 0   ;;  %s1175_s20 = smov 0  }
   0xa LB: > { %s789_s21 = sadd.s32 4294967295, %s1131_s20   ;;  %s790_s22 = sadd.s32 4294967294, %s1131_s20   ;;  %s1131_s20 = sphi %s1175_s20, %s23_s20   ;;  %s1127_s19 = sphi %s1173_s19, %s1450_s19   ;;  %s1123_s18 = sphi %s1171_s18, %s1449_s18   ;;  %s1119_s17 = sphi %s1169_s17, %s1448_s17   ;;  %s1115_s16 = sphi %s1167_s16, %s1447_s16   ;;  %s1111_s15 = sphi %s1165_s15, %s1446_s15  }
   0xb   : > { %s35_s23 = sadd.s32 1, %s1127_s19  ;;  %s44_s24 = sadd.s32 1, %s1119_s17 }
   0xc   : > { %p37_p0 = scmp.ge.s32.totalorder %s35_s23, 2  ;;  %p51_p1 = scmp.ne.s32.totalorder %s1119_s17, %s1115_s16 }
   0xd   : > { %p52_p2 = scmp.eq.s32.totalorder %s1131_s20, 0  ;;  %p57_p3 = scmp.ne.s32.totalorder %s1115_s16, %s1111_s15 }
   0xe   : > { %s1452_s23 = smov (%p37_p0, %s35_s23), 0  ;;  %p58_p5 = scmp.eq.s32.totalorder %s789_s21, 0 }
   0xf   : > { %1436 = sst [smem:[#allocation11_spill]] %s1452_s23  ;;  %p1206_p4 = por %p52_p2, %p51_p1 }
  0x10   : > { %s39_s26 = ssub.s32 %s1127_s19, %s1452_s23  ;;  %p153_p6 = scmp.eq.s32.totalorder %s789_s21, 1 }
  0x11   : > { %p42_p7 = scmp.eq.s32.totalorder %s39_s26, 0  ;;  %p1212_p8 = por %p58_p5, %p57_p3 }
  0x12   : > { %p1216_p9 = por %p153_p6, %p51_p1  ;;  %p159_p10 = scmp.eq.s32.totalorder %s790_s22, 1 }
  0x13   : > { %s1221_s29 = scalar_select %p42_p7, %s1119_s17, %s44_s24  }
  0x14   : > { %p1223_p11 = por %p159_p10, %p57_p3  ;;  %p792_p12 = scmp.ge.s32.totalorder %s1131_s20, 2 }
  0x15   : > { %1440 = sst [smem:[#allocation12_spill]] %s1221_s29  ;;  %p925_p13 = scmp.lt.s32.totalorder %s1131_s20, 2 }
  0x16   : > { %s1230_s5 = sand.u32 1, %s1119_s17   ;;  %s890_s7 = sshll.u32 %s1127_s19, 6 }
  0x17   : > { %s793_s6 = sshll.u32 %s1230_s5, 6  ;;  %s1442_s0 = sld [smem:[#allocation13_spill]] }
  0x18   : > { %s189_s11 = scalar_lea.vmem [#allocation2], %s793_s6  ;;  %p1239_p0 = pnand %p925_p13, %p1206_p4 }
  0x19   : > { %s198_s12 = sshll.u32 %s189_s11, 4  ;;  %p797_p1 = scmp.ge.s32.totalorder %s1131_s20, 1  ;;  %s199_s12 = int_to_ptr.vmem [resolvable:$true] %s198_s12 }
  0x1a   : > { %s186_s21 = scalar_lea.sflag [#allocation3], %s1230_s5  ;;  %s1133_s22 = smov 128  }
  0x1b   : > { %s1134_s24 = smov 8   ;;  %p229_p2 = scmp.lt.s32.totalorder %s1131_s20, 3 }
  0x1c   : > { %s903_s26 = smul.u32 80, %s1230_s5  ;;  %s1135_s23 = smov 64  }
  0x1d   : > { %s195_s10 = scalar_lea.hbm %s1442_s0, %s890_s7  ;;  %p230_p3 = pnand %p797_p1, %p229_p2 }
  0x1e   : > { %s196_s13 = sshll.u32 %s195_s10, 4  ;;  %s904_s6 = smul.u32 80, %s1127_s19  ;;  %s197_s13 = int_to_ptr.hbm [resolvable:$true] %s196_s13 }
  0x1f   : > { %917 = dma.hbm_to_vmem [thread:$0]  (!%p1239_p0), %s197_s13, 1024, %s199_s12, %s186_s21, %s1133_s22, %s1133_s22, %s1134_s24  }
  0x20   : > { %s218_s25 = scalar_lea.hbm %s1430_s1, %s904_s6  ;;  %s212_s9 = scalar_lea.vmem [#allocation5], %s903_s26 }
  0x21   : > { %s221_s10 = sshll.u32 %s212_s9, 4  ;;  %s219_s11 = sshll.u32 %s218_s25, 4  ;;  %s222_s10 = int_to_ptr.vmem [resolvable:$true] %s221_s10  ;;  %s220_s11 = int_to_ptr.hbm [resolvable:$true] %s219_s11 }
  0x22   : > { %s209_s0 = scalar_lea.sflag [#allocation6], %s1230_s5  ;;  %s1136_s29 = smov 4  }
  0x23   : > { %920 = dma.hbm_to_vmem [thread:$0]  (!%p1239_p0), %s220_s11, 1280, %s222_s10, %s209_s0, %s1135_s23, %s1135_s23, %s1136_s29  }
  0x24   : > { %233 = sbr.rel (%p230_p3) target bundleno = 261 (0x105), region = 36  ;;  %s1257_s12 = sand.u32 (!%p230_p3), 1, %s1115_s16  }
  0x25   : > { %s798_s13 = sshll.u32 (!%p230_p3), %s1257_s12, 6  ;;  %s236_s21 = scalar_lea.sflag (!%p230_p3), [#allocation3], %s1257_s12 }
  0x26   : > { %s1261_s22 = scalar_lea.vmem (!%p230_p3), [#allocation2], %s798_s13 }
  0x29   : > { %1098 = dma.done.wait (%p1212_p8), %s236_s21, 1024  }
  0x2a   : > { %1100 = vsyncadd (%p1212_p8), %s236_s21, 4294966272  ;;  %s905_s0 = smul.u32 80, %s1257_s12  ;;  %s246_s23 = scalar_lea.sflag [#allocation6], %s1257_s12 }
  0x2c   : > { %s1269_s29 = scalar_lea.vmem [#allocation5], %s905_s0 }
  0x2d   : > { %1102 = dma.done.wait (%p1212_p8), %s246_s23, 1280  }
  0x2e   : > { %1104 = vsyncadd (%p1212_p8), %s246_s23, 4294966016  ;;  %v1137_v0 = vmov 0   ;;  %v357_v1 = vld [vmem:[%s1269_s29 + $0x10] sm:$0xf]  ;;  %v459_v2 = vld [vmem:[%s1269_s29 + $0x20] sm:$0xf] }
  0x2f   : > { %982 = vset.pattern.permute.xlu0 %v1137_v0  ;;  %983 = vset.pattern.permute.xlu1 %v1137_v0  ;;  %v528_v3 = vld [vmem:[%s1269_s29 + $0x30] sm:$0xf]  ;;  %v387_v4 = vunpack.c.l.b16 %v357_v1  ;;  %v469_v5 = vunpack.c.l.b16 %v459_v2  ;;  %v597_v7 = vld [vmem:[%s1269_s29 + $0x40] sm:$0xf]  ;;  %vm406_vm0 = vcmask 1043456   ;;  %v896_v19 = vld [vmem:[%s1269_s29 + $0x8] sm:$0xff] }
  0x30   : > { %984 = vset.pattern.permute.xlu2 %v1137_v0  ;;  %v538_v6 = vunpack.c.l.b16 %v528_v3  ;;  %v607_v8 = vunpack.c.l.b16 %v597_v7  ;;  %v305_v13 = vld [vmem:[%s1432_s3] sm:$0xff]  ;;  %v307_v17 = vld [vmem:[%s1432_s3 + $0x10] sm:$0xff]  ;;  %v898_v20 = vld [vmem:[%s1269_s29 + $0x18] sm:$0xff]  ;;  %vm393_vm1 = vcmask 326656   ;;  %s906_s8 = smul.u32 320, %s1257_s12  ;;  %s663_s21 = scalar_lea.sflag [#allocation4], %s1257_s12 }
  0x31   : > { %v390_v9 = vpack.c.b16 %v387_v4, %v387_v4  ;;  %v472_v10 = vpack.c.b16 %v469_v5, %v469_v5  ;;  %315 = vperm.xlu0 %982, %v305_v13   ;;  %v900_v21 = vld [vmem:[%s1269_s29 + $0x28] sm:$0xff]  ;;  %v902_v22 = vld [vmem:[%s1269_s29 + $0x38] sm:$0xff]  ;;  %325 = vperm.xlu1 %983, %v307_v17   ;;  %v895_v23 = vld [vmem:[%s1269_s29] sm:$0xff]  ;;  %s1065_s5 = scalar_lea.hbm %s1433_s4, 640 }
  0x32   : > { %v541_v11 = vpack.c.b16 %v538_v6, %v538_v6  ;;  %v610_v12 = vpack.c.b16 %v607_v8, %v607_v8  ;;  %v897_v24 = vld [vmem:[%s1269_s29 + $0x10] sm:$0xff]  ;;  %v306_v25 = vld [vmem:[%s1432_s3 + $0x8] sm:$0xff]  ;;  %v899_v26 = vld [vmem:[%s1269_s29 + $0x20] sm:$0xff]  ;;  %s1340_s25 = scalar_lea.vmem [#allocation7], %s906_s8 }
  0x33   : > { %v408_v14 = vsel %vm406_vm0, %v390_v9, 0  ;;  %v476_v15 = vsel %vm406_vm0, %v472_v10, 0  ;;  %v901_v27 = vld [vmem:[%s1269_s29 + $0x30] sm:$0xff]  ;;  %v308_v29 = vld [vmem:[%s1432_s3 + $0x18] sm:$0xff]  ;;  %v892_v30 = vld [vmem:[%s1431_s2 + $0x8] sm:$0xff] }
  0x34   : > { %v545_v16 = vsel %vm406_vm0, %v541_v11, 0  ;;  %415 = vmatpush.bf16.msra.mxu0 %v408_v14  ;;  %483 = vmatpush.bf16.msra.mxu1 %v476_v15  ;;  %v614_v18 = vsel %vm406_vm0, %v610_v12, 0  ;;  %v891_v28 = vld [vmem:[%s1431_s2] sm:$0xff]  ;;  %v312_v31 = vld [vmem:[%s1432_s3 + $0x38] sm:$0xff]  ;;  %v311_v32 = vld [vmem:[%s1432_s3 + $0x30] sm:$0xff] }
  0x35   : > { %552 = vmatpush.bf16.msra.mxu2 %v545_v16  ;;  %621 = vmatpush.bf16.msra.mxu3 %v614_v18  ;;  %v309_v33 = vld [vmem:[%s1432_s3 + $0x20] sm:$0xff]  ;;  %v310_v34 = vld [vmem:[%s1432_s3 + $0x28] sm:$0xff]  ;;  %v893_v35 = vld [vmem:[%s1431_s2 + $0x10] sm:$0xff] }
  0x36   : > { %335 = vperm.xlu2 %984, %v309_v33   ;;  %v894_v36 = vld [vmem:[%s1431_s2 + $0x18] sm:$0xff] }
  0x38   : > { %416 = vmatpush.bf16.msra.mxu0 %v896_v19  ;;  %484 = vmatpush.bf16.msra.mxu1 %v898_v20 }
  0x39   : > { %553 = vmatpush.bf16.msra.mxu2 %v900_v21  ;;  %622 = vmatpush.bf16.msra.mxu3 %v902_v22 }
  0x3a   : > { %320 = vperm.xlu0 %982, %v306_v25   ;;  %330 = vperm.xlu1 %983, %v308_v29  }
  0x3c   : > { %417 = vmatpush.bf16.msra.mxu0 %v895_v23  ;;  %485 = vmatpush.bf16.msra.mxu1 %v897_v24 }
  0x3d   : > { %554 = vmatpush.bf16.msra.mxu2 %v899_v26  ;;  %623 = vmatpush.bf16.msra.mxu3 %v901_v27 }
  0x3e   : > { %340 = vperm.xlu2 %984, %v310_v34   ;;  %v282_v34 = vld [vmem:[%s1261_s22 + $0x8] sm:$0xff] }
  0x3f   : > { %823 = vmatmul.msk.bf16.vlgmr.msra.gmra.mxu0 %vm393_vm1, %v891_v28  ;;  %835 = vmatmul.msk.bf16.vlgmr.msra.gmra.mxu1 %vm393_vm1, %v891_v28  ;;  %290 = vst [vmem:[%s1340_s25 + $0x8] sm:$0xff] %v282_v34 }
  0x40   : > { %855 = vmatmul.msk.bf16.vlgmr.msra.gmra.mxu2 %vm393_vm1, %v891_v28  ;;  %875 = vmatmul.msk.bf16.vlgmr.msra.gmra.mxu3 %vm393_vm1, %v891_v28 }
  0x42   : > { %350 = vperm.xlu1 %983, %v312_v31   ;;  %345 = vperm.xlu0 %982, %v311_v32   ;;  %v281_v32 = vld [vmem:[%s1261_s22] sm:$0xff] }
  0x43   : > { %289 = vst [vmem:[%s1340_s25] sm:$0xff] %v281_v32 }
  0x4f   : > { %824 = vmatmul.msk.bf16.gmra.mxu0 %vm393_vm1, %v892_v30  ;;  %836 = vmatmul.msk.bf16.gmra.mxu1 %vm393_vm1, %v892_v30 }
  0x50   : > { %856 = vmatmul.msk.bf16.gmra.mxu2 %vm393_vm1, %v892_v30  ;;  %876 = vmatmul.msk.bf16.gmra.mxu3 %vm393_vm1, %v892_v30 }
  0x5f   : > { %825 = vmatmul.msk.bf16.gmra.mxu0 %vm393_vm1, %v893_v35  ;;  %837 = vmatmul.msk.bf16.gmra.mxu1 %vm393_vm1, %v893_v35 }
  0x60   : > { %857 = vmatmul.msk.bf16.gmra.mxu2 %vm393_vm1, %v893_v35  ;;  %877 = vmatmul.msk.bf16.gmra.mxu3 %vm393_vm1, %v893_v35 }
  0x6f   : > { %826 = vmatmul.msk.bf16.gmra.mxu0 %vm393_vm1, %v894_v36  ;;  %838 = vmatmul.msk.bf16.gmra.mxu1 %vm393_vm1, %v894_v36 }
  0x70   : > { %858 = vmatmul.msk.bf16.gmra.mxu2 %vm393_vm1, %v894_v36  ;;  %878 = vmatmul.msk.bf16.gmra.mxu3 %vm393_vm1, %v894_v36 }
  0x90   : > { %v336_v19 = vpop.permute.xlu2 %335 }
  0x98   : > { %v341_v33 = vpop.permute.xlu2 %340 }
  0xa3   : > { %v316_v37 = vpop.permute.xlu0 %315  ;;  %v326_v57 = vpop.permute.xlu1 %325 }
  0xac   : > { %v321_v44 = vpop.permute.xlu0 %320  ;;  %v331_v6 = vpop.permute.xlu1 %330 }
  0xbc   : > { %v419_v38 = vpop.f32.mrf.mxu0  ;;  %v487_v39 = vpop.f32.mrf.mxu1 }
  0xbd   : > { %v420_v40 = vadd.f32 %v419_v38, %v316_v37  ;;  %v488_v41 = vadd.f32 %v487_v39, %v316_v37 }
  0xbf   : > { %v439_v42 = vmax.f32 %v420_v40, 0.0  ;;  %v507_v43 = vmax.f32 %v488_v41, 0.0 }
  0xc1   : > { %447 = vst [vmem:[%s1340_s25 + $0x10] sm:$0xff] %v439_v42  ;;  %v284_v42 = vld [vmem:[%s1261_s22 + $0x18] sm:$0xff] }
  0xc2   : > { %839 = vst [vmem:[%s1340_s25 + $0x60] sm:$0xff] %v507_v43 }
  0xc3   : > { %v556_v45 = vpop.f32.mrf.mxu2  ;;  %v625_v46 = vpop.f32.mrf.mxu3  ;;  %292 = vst [vmem:[%s1340_s25 + $0x58] sm:$0xff] %v284_v42 }
  0xc4   : > { %v557_v47 = vadd.f32 %v556_v45, %v316_v37  ;;  %v626_v48 = vadd.f32 %v625_v46, %v316_v37  ;;  %v421_v49 = vpop.f32.mrf.mxu0  ;;  %v489_v50 = vpop.f32.mrf.mxu1  ;;  %v283_v37 = vld [vmem:[%s1261_s22 + $0x10] sm:$0xff] }
  0xc5   : > { %v422_v51 = vadd.f32 %v421_v49, %v321_v44  ;;  %v490_v52 = vadd.f32 %v489_v50, %v321_v44  ;;  %291 = vst [vmem:[%s1340_s25 + $0x50] sm:$0xff] %v283_v37  ;;  %v285_v49 = vld [vmem:[%s1261_s22 + $0x20] sm:$0xff]  ;;  %v346_v50 = vpop.permute.xlu0 %345 }
  0xc6   : > { %v576_v53 = vmax.f32 %v557_v47, 0.0  ;;  %v645_v54 = vmax.f32 %v626_v48, 0.0  ;;  %293 = vst [vmem:[%s1340_s25 + $0xa0] sm:$0xff] %v285_v49 }
  0xc7   : > { %v440_v55 = vmax.f32 %v422_v51, 0.0  ;;  %v508_v56 = vmax.f32 %v490_v52, 0.0  ;;  %v286_v51 = vld [vmem:[%s1261_s22 + $0x28] sm:$0xff] }
  0xc8   : > { %859 = vst [vmem:[%s1340_s25 + $0xb0] sm:$0xff] %v576_v53 }
  0xc9   : > { %879 = vst [vmem:[%s1340_s25 + $0x100] sm:$0xff] %v645_v54  ;;  %v287_v54 = vld [vmem:[%s1261_s22 + $0x30] sm:$0xff] }
  0xca   : > { %448 = vst [vmem:[%s1340_s25 + $0x18] sm:$0xff] %v440_v55 }
  0xcb   : > { %840 = vst [vmem:[%s1340_s25 + $0x68] sm:$0xff] %v508_v56  ;;  %v558_v58 = vpop.f32.mrf.mxu2  ;;  %v627_v59 = vpop.f32.mrf.mxu3 }
  0xcc   : > { %v559_v60 = vadd.f32 %v558_v58, %v321_v44  ;;  %v628_v61 = vadd.f32 %v627_v59, %v321_v44  ;;  %v424_v62 = vpop.f32.mrf.mxu0  ;;  %v492_v63 = vpop.f32.mrf.mxu1  ;;  %v288_v59 = vld [vmem:[%s1261_s22 + $0x38] sm:$0xff]  ;;  %294 = vst [vmem:[%s1340_s25 + $0xa8] sm:$0xff] %v286_v51  ;;  %s907_s22 = smul.u32 320, %s1123_s18  ;;  %s676_s18 = sshll.u32 %s1340_s25, 4  ;;  %s677_s18 = int_to_ptr.vmem [resolvable:$true] %s676_s18 }
  0xcd   : > { %v425_v0 = vadd.f32 %v424_v62, %v326_v57  ;;  %v493_v1 = vadd.f32 %v492_v63, %v326_v57  ;;  %295 = vst [vmem:[%s1340_s25 + $0xf0] sm:$0xff] %v287_v54 }
  0xce   : > { %v577_v2 = vmax.f32 %v559_v60, 0.0  ;;  %v646_v3 = vmax.f32 %v628_v61, 0.0  ;;  %296 = vst [vmem:[%s1340_s25 + $0xf8] sm:$0xff] %v288_v59  ;;  %s675_s11 = scalar_lea.hbm %s1433_s4, %s907_s22 }
  0xcf   : > { %v441_v4 = vmax.f32 %v425_v0, 0.0  ;;  %v509_v5 = vmax.f32 %v493_v1, 0.0  ;;  %s678_s13 = sshll.u32 %s675_s11, 4  ;;  %s679_s13 = int_to_ptr.hbm [resolvable:$true] %s678_s13 }
  0xd0   : > { %860 = vst [vmem:[%s1340_s25 + $0xb8] sm:$0xff] %v577_v2  ;;  %v351_v2 = vpop.permute.xlu1 %350  ;;  %s1059_s0 = sshra.s32 %s679_s13, 4  ;;  %s1060_s0 = int_to_ptr.hbm [resolvable:$true] %s1059_s0 }
  0xd1   : > { %880 = vst [vmem:[%s1340_s25 + $0x108] sm:$0xff] %v646_v3  ;;  %s1061_s23 = scalar_lea.hbm %s1060_s0, 320  ;;  %p1066_p7 = scmp.lt.s32.totalorder %s1060_s0, %s1433_s4 }
  0xd2   : > { %449 = vst [vmem:[%s1340_s25 + $0x20] sm:$0xff] %v441_v4  ;;  %p1062_p4 = scmp.ne.s32.totalorder %s1060_s0, %s1061_s23  ;;  %p1067_p8 = scmp.lt.s32.totalorder %s1065_s5, %s1061_s23 }
  0xd3   : > { %841 = vst [vmem:[%s1340_s25 + $0x70] sm:$0xff] %v509_v5  ;;  %v561_v7 = vpop.f32.mrf.mxu2  ;;  %v630_v8 = vpop.f32.mrf.mxu3 }
  0xd4   : > { %v562_v9 = vadd.f32 %v561_v7, %v326_v57  ;;  %v631_v10 = vadd.f32 %v630_v8, %v326_v57  ;;  %v426_v11 = vpop.f32.mrf.mxu0  ;;  %v494_v12 = vpop.f32.mrf.mxu1  ;;  %p1063_p5 = pnand %p1062_p4, %p1216_p9  ;;  %p1068_p10 = por %p1067_p8, %p1066_p7 }
  0xd5   : > { %v427_v13 = vadd.f32 %v426_v11, %v331_v6  ;;  %v495_v14 = vadd.f32 %v494_v12, %v331_v6 }
  0xd6   : > { %v578_v15 = vmax.f32 %v562_v9, 0.0  ;;  %v647_v16 = vmax.f32 %v631_v10, 0.0  ;;  %p1064_p6 = pneg %p1063_p5 }
  0xd7   : > { %v442_v17 = vmax.f32 %v427_v13, 0.0  ;;  %v510_v18 = vmax.f32 %v495_v14, 0.0 }
  0xd8   : > { %861 = vst [vmem:[%s1340_s25 + $0xc0] sm:$0xff] %v578_v15  ;;  %p1069_p13 = pnand %p1068_p10, %p1064_p6 }
  0xd9   : > { %881 = vst [vmem:[%s1340_s25 + $0x110] sm:$0xff] %v647_v16 }
  0xda   : > { %450 = vst [vmem:[%s1340_s25 + $0x28] sm:$0xff] %v442_v17 }
  0xdb   : > { %842 = vst [vmem:[%s1340_s25 + $0x78] sm:$0xff] %v510_v18  ;;  %v563_v20 = vpop.f32.mrf.mxu2  ;;  %v632_v21 = vpop.f32.mrf.mxu3 }
  0xdc   : > { %v564_v22 = vadd.f32 %v563_v20, %v331_v6  ;;  %v633_v23 = vadd.f32 %v632_v21, %v331_v6  ;;  %v429_v24 = vpop.f32.mrf.mxu0  ;;  %v497_v25 = vpop.f32.mrf.mxu1 }
  0xdd   : > { %v430_v26 = vadd.f32 %v429_v24, %v336_v19  ;;  %v498_v27 = vadd.f32 %v497_v25, %v336_v19 }
  0xde   : > { %v579_v28 = vmax.f32 %v564_v22, 0.0  ;;  %v648_v29 = vmax.f32 %v633_v23, 0.0 }
  0xdf   : > { %v443_v30 = vmax.f32 %v430_v26, 0.0  ;;  %v511_v31 = vmax.f32 %v498_v27, 0.0 }
  0xe0   : > { %862 = vst [vmem:[%s1340_s25 + $0xc8] sm:$0xff] %v579_v28 }
  0xe1   : > { %882 = vst [vmem:[%s1340_s25 + $0x118] sm:$0xff] %v648_v29 }
  0xe2   : > { %451 = vst [vmem:[%s1340_s25 + $0x30] sm:$0xff] %v443_v30 }
  0xe3   : > { %843 = vst [vmem:[%s1340_s25 + $0x80] sm:$0xff] %v511_v31  ;;  %v566_v35 = vpop.f32.mrf.mxu2  ;;  %v635_v36 = vpop.f32.mrf.mxu3 }
  0xe4   : > { %v567_v38 = vadd.f32 %v566_v35, %v336_v19  ;;  %v636_v39 = vadd.f32 %v635_v36, %v336_v19  ;;  %v431_v40 = vpop.f32.mrf.mxu0  ;;  %v499_v41 = vpop.f32.mrf.mxu1 }
  0xe5   : > { %v432_v43 = vadd.f32 %v431_v40, %v341_v33  ;;  %v500_v44 = vadd.f32 %v499_v41, %v341_v33 }
  0xe6   : > { %v580_v45 = vmax.f32 %v567_v38, 0.0  ;;  %v649_v46 = vmax.f32 %v636_v39, 0.0 }
  0xe7   : > { %v444_v47 = vmax.f32 %v432_v43, 0.0  ;;  %v512_v48 = vmax.f32 %v500_v44, 0.0 }
  0xe8   : > { %863 = vst [vmem:[%s1340_s25 + $0xd0] sm:$0xff] %v580_v45 }
  0xe9   : > { %883 = vst [vmem:[%s1340_s25 + $0x120] sm:$0xff] %v649_v46 }
  0xea   : > { %452 = vst [vmem:[%s1340_s25 + $0x38] sm:$0xff] %v444_v47 }
  0xeb   : > { %844 = vst [vmem:[%s1340_s25 + $0x88] sm:$0xff] %v512_v48  ;;  %v568_v52 = vpop.f32.mrf.mxu2  ;;  %v637_v53 = vpop.f32.mrf.mxu3 }
  0xec   : > { %v569_v55 = vadd.f32 %v568_v52, %v341_v33  ;;  %v638_v56 = vadd.f32 %v637_v53, %v341_v33  ;;  %v434_v57 = vpop.f32.mrf.mxu0  ;;  %v502_v58 = vpop.f32.mrf.mxu1 }
  0xed   : > { %v435_v60 = vadd.f32 %v434_v57, %v346_v50  ;;  %v503_v61 = vadd.f32 %v502_v58, %v346_v50 }
  0xee   : > { %v581_v62 = vmax.f32 %v569_v55, 0.0  ;;  %v650_v63 = vmax.f32 %v638_v56, 0.0 }
  0xef   : > { %v445_v0 = vmax.f32 %v435_v60, 0.0  ;;  %v513_v1 = vmax.f32 %v503_v61, 0.0 }
  0xf0   : > { %864 = vst [vmem:[%s1340_s25 + $0xd8] sm:$0xff] %v581_v62 }
  0xf1   : > { %884 = vst [vmem:[%s1340_s25 + $0x128] sm:$0xff] %v650_v63 }
  0xf2   : > { %453 = vst [vmem:[%s1340_s25 + $0x40] sm:$0xff] %v445_v0 }
  0xf3   : > { %845 = vst [vmem:[%s1340_s25 + $0x90] sm:$0xff] %v513_v1  ;;  %v571_v3 = vpop.f32.mrf.mxu2  ;;  %v640_v4 = vpop.f32.mrf.mxu3 }
  0xf4   : > { %v572_v5 = vadd.f32 %v571_v3, %v346_v50  ;;  %v641_v6 = vadd.f32 %v640_v4, %v346_v50  ;;  %v436_v7 = vpop.f32.mrf.mxu0  ;;  %v504_v8 = vpop.f32.mrf.mxu1 }
  0xf5   : > { %v437_v9 = vadd.f32 %v436_v7, %v351_v2  ;;  %v505_v10 = vadd.f32 %v504_v8, %v351_v2 }
  0xf6   : > { %v582_v11 = vmax.f32 %v572_v5, 0.0  ;;  %v651_v12 = vmax.f32 %v641_v6, 0.0 }
  0xf7   : > { %v446_v13 = vmax.f32 %v437_v9, 0.0  ;;  %v514_v14 = vmax.f32 %v505_v10, 0.0 }
  0xf8   : > { %865 = vst [vmem:[%s1340_s25 + $0xe0] sm:$0xff] %v582_v11 }
  0xf9   : > { %885 = vst [vmem:[%s1340_s25 + $0x130] sm:$0xff] %v651_v12 }
  0xfa   : > { %454 = vst [vmem:[%s1340_s25 + $0x48] sm:$0xff] %v446_v13 }
  0xfb   : > { %846 = vst [vmem:[%s1340_s25 + $0x98] sm:$0xff] %v514_v14  ;;  %v573_v15 = vpop.f32.mrf.mxu2  ;;  %v642_v16 = vpop.f32.mrf.mxu3 }
  0xfc   : > { %v574_v17 = vadd.f32 %v573_v15, %v351_v2  ;;  %v643_v18 = vadd.f32 %v642_v16, %v351_v2 }
  0xfe   : > { %v583_v19 = vmax.f32 %v574_v17, 0.0  ;;  %v652_v20 = vmax.f32 %v643_v18, 0.0 }
 0x100   : > { %866 = vst [vmem:[%s1340_s25 + $0xe8] sm:$0xff] %v583_v19 }
 0x101   : > { %886 = vst [vmem:[%s1340_s25 + $0x138] sm:$0xff] %v652_v20 }
 0x102   : > { %1072 = shalt.err (!%p1069_p13)
}
 0x103   : > { %s1138_s12 = smov 128   ;;  %s1139_s26 = smov 8  }
 0x104   : > { %912 = dma.vmem_to_hbm [thread:$0]  (%p1216_p9), %s677_s18, 5120, %s679_s13, %s663_s21, %s1138_s12, %s1138_s12, %s1139_s26  }
 0x105 PF: > { %s693_s6 = sand.u32 1, %s1111_s15   ;;  %p922_p0 = pnand %p792_p12, %p1223_p11 }
 0x106   : > { %s694_s7 = scalar_lea.sflag [#allocation4], %s693_s6 }
 0x107   : > { %p923_p1 = pneg %p922_p0 }
 0x109   : > { %1106 = dma.done.wait (%p923_p1), %s694_s7, 5120  }
 0x10a   : > { %1108 = vsyncadd (%p923_p1), %s694_s7, 4294962176  ;;  %s23_s20 = sadd.s32 1, %s1131_s20   ;;  %s1444_s8 = sld [smem:[#allocation12_spill]] }
 0x10b   : > { %p20_p2 = scmp.ge.s32.totalorder %s23_s20, 4   ;;  %s1445_s28 = sld [smem:[#allocation11_spill]] }
 0x10c   : > { %s1446_s15 = smov %s1115_s16  ;;  %s1447_s16 = smov %s1119_s17 }
 0x10d   : > { %s1449_s18 = smov %s1127_s19  ;;  %22 = sbr.rel (!%p20_p2) target bundleno = 10 (0xa), region = 97 }
 0x110   : > { %s1448_s17 = smov %s1444_s8 }
 0x111   : > { %s1450_s19 = smov %s1445_s28 }
 0x112   :  { %700 = vsyncpa [#allocation3], 1 }
 0x113   :  { %702 = vsyncpa [#allocation3 + $0x1], 1 }
 0x114   :  { %703 = vsyncpa [#allocation6], 1 }
 0x115   :  { %705 = vsyncpa [#allocation6 + $0x1], 1 }
 0x116   :  { %706 = vsyncpa [#allocation4], 1 }
 0x117   :  { %708 = vsyncpa [#allocation4 + $0x1], 1 }

</bundles_post_ra>
